<compile_context>
chip_gen: v5e
topology: v5e:2x2
jax: 0.10.0
libtpu: 0.0.40
codegen_flags: <defaults>
</compile_context>

<pallas_src>
import jax
import jax.numpy as jnp
from jax.experimental import pallas as pl
from jax.experimental.pallas import tpu as pltpu

# Synthetic env sizes (CartPole-like): observation dim 4, 2 discrete actions.
N_STATES = 4
N_ACTIONS = 2
HIDDEN = 20

LANE = 128        # TPU lane width (last-dim vreg width)
SUBLANE = 8       # f32 sublane tiling
W2_ROW0 = SUBLANE               # w2 slab starts on a sublane-aligned row
P_ROWS = W2_ROW0 + LANE         # 136 rows total (multiple of 8)

assert N_STATES + 1 <= SUBLANE  # w1 rows + bias row fit in the first 8-row tile
assert HIDDEN + 1 <= LANE       # hidden units + constant-1 lane fit in 128 lanes


def _mlp_kernel(x_ref, p_ref, o_ref):
    # x: (B, N_STATES) f32
    # p: (P_ROWS, LANE) f32 parameter slab:
    #      rows 0..N_STATES-1          : w1 (cols 0..HIDDEN-1, rest 0)
    #      row  N_STATES               : b1 in cols 0..HIDDEN-1, 1.0 in col HIDDEN
    #      rows W2_ROW0..W2_ROW0+127   : w2 slab (row HIDDEN carries b2), rest 0
    # o: (B, LANE) lane-dense output slab (real Q-values in lanes 0..N_ACTIONS-1)
    x = x_ref[...]
    w1 = p_ref[0:N_STATES, :]                       # (N_STATES, 128)
    brow = p_ref[N_STATES:N_STATES + 1, :]          # (1, 128)
    w2 = p_ref[W2_ROW0:W2_ROW0 + LANE, :]           # (128, 128)

    # Layer 1 (MXU) + bias row.  Lane HIDDEN becomes a constant 1 after ReLU
    # (w1's column HIDDEN is zero, brow[HIDDEN] = 1.0); lanes > HIDDEN stay 0.
    h = jnp.dot(x, w1, preferred_element_type=jnp.float32) + brow
    h = jnp.maximum(h, 0.0)

    # Layer 2 (MXU).  Row HIDDEN of the w2 slab holds b2, so the bias comes
    # for free via the constant-1 lane; output lanes >= N_ACTIONS stay 0.
    o_ref[...] = jnp.dot(h, w2, preferred_element_type=jnp.float32)


def pack_params(w1, b1, w2, b2):
    """Pack all Linear params (input-major) into one lane-dense slab. Run ONCE
    per parameter update; the padded regions must stay exactly zero."""
    slab = jnp.zeros((P_ROWS, LANE), jnp.float32)
    slab = slab.at[:N_STATES, :HIDDEN].set(w1)          # w1: (N_STATES, HIDDEN)
    slab = slab.at[N_STATES, :HIDDEN].set(b1)           # b1
    slab = slab.at[N_STATES, HIDDEN].set(1.0)           # constant-1 lane source
    slab = slab.at[W2_ROW0:W2_ROW0 + HIDDEN, :N_ACTIONS].set(w2)  # w2: (HIDDEN, N_ACTIONS)
    slab = slab.at[W2_ROW0 + HIDDEN, :N_ACTIONS].set(b2)          # b2
    return slab


@jax.jit
def net_forward_slab(x, param_slab):
    """Fused forward pass. x: (B, N_STATES) f32 -> (B, 128) f32 Q-slab
    (Q-values in lanes 0..N_ACTIONS-1, remaining lanes exactly 0)."""
    B = x.shape[0]
    vmem_spec = pl.BlockSpec(memory_space=pltpu.MemorySpace.VMEM)
    return pl.pallas_call(
        _mlp_kernel,
        out_shape=jax.ShapeDtypeStruct((B, LANE), jnp.float32),
        in_specs=[vmem_spec, vmem_spec],
        out_specs=vmem_spec,
    )(x, param_slab)


@jax.jit
def net_forward(x, param_slab):
    """NET.forward semantics: (B, N_STATES) -> (B, N_ACTIONS) Q-values.
    Prefer net_forward_slab (or fusing the action argmax) in hot loops to
    avoid the trailing lane slice/copy."""
    return net_forward_slab(x, param_slab)[:, :N_ACTIONS]


def init_params(key):
    """weights_init: Linear.weight ~ Normal(0, 0.1), Linear.bias = 0."""
    k1, k2 = jax.random.split(key)
    # PyTorch Linear.weight is (out, in); we store transposed (in, out).
    w1 = (jax.random.normal(k1, (HIDDEN, N_STATES), jnp.float32) * 0.1).T
    b1 = jnp.zeros((HIDDEN,), jnp.float32)
    w2 = (jax.random.normal(k2, (N_ACTIONS, HIDDEN), jnp.float32) * 0.1).T
    b2 = jnp.zeros((N_ACTIONS,), jnp.float32)
    return w1, b1, w2, b2


if __name__ == "__main__":
    key = jax.random.PRNGKey(0)
    kx, kp = jax.random.split(key)

    batch = 8  # multiple of 8 keeps the f32 sublane tiling exactly full
    x = jax.random.normal(kx, (batch, N_STATES), jnp.float32)

    w1, b1, w2, b2 = init_params(kp)
    param_slab = pack_params(w1, b1, w2, b2)

    out = net_forward(x, param_slab)
    out = jax.block_until_ready(out)

    # Pure-JAX reference (highest precision). Tolerance covers the f32 MXU
    # pass decomposition vs. the exact reference FMA order.
    h_ref = jnp.maximum(
        jnp.dot(x, w1, precision=jax.lax.Precision.HIGHEST) + b1, 0.0)
    ref = jnp.dot(h_ref, w2, precision=jax.lax.Precision.HIGHEST) + b2

    assert out.shape == (batch, N_ACTIONS)
    assert jnp.allclose(out, ref, atol=1e-3, rtol=1e-3)

    # Also check the padding-lane invariant of the slab path.
    slab = jax.block_until_ready(net_forward_slab(x, param_slab))
    assert jnp.allclose(slab[:, :N_ACTIONS], ref, atol=1e-3, rtol=1e-3)
    assert jnp.all(slab[:, N_ACTIONS:] == 0.0)

    print("KERNEL_OK")
</pallas_src>

<mosaic_0001>
module attributes {stable_mosaic.version = 11 : i64} {
  func.func @_mlp_kernel(%arg0: memref<8x4xf32, #tpu.memory_space<vmem>>, %arg1: memref<136x128xf32, #tpu.memory_space<vmem>>, %arg2: memref<8x128xf32, #tpu.memory_space<vmem>>) attributes {dimension_semantics = [], scalar_prefetch = 0 : i64, scratch_operands = 0 : i64, tpu.core_type = #tpu.core_type<tc>} {
    %c0 = arith.constant 0 : index
    %c0_0 = arith.constant 0 : index
    %0 = vector.load %arg0[%c0, %c0_0] : memref<8x4xf32, #tpu.memory_space<vmem>>, vector<8x4xf32>
    %c0_1 = arith.constant 0 : index
    %c0_2 = arith.constant 0 : index
    %1 = vector.load %arg1[%c0_1, %c0_2] : memref<136x128xf32, #tpu.memory_space<vmem>>, vector<4x128xf32>
    %c4 = arith.constant 4 : index
    %c0_3 = arith.constant 0 : index
    %2 = vector.load %arg1[%c4, %c0_3] : memref<136x128xf32, #tpu.memory_space<vmem>>, vector<1x128xf32>
    %c8 = arith.constant 8 : index
    %c0_4 = arith.constant 0 : index
    %3 = vector.load %arg1[%c8, %c0_4] : memref<136x128xf32, #tpu.memory_space<vmem>>, vector<128x128xf32>
    %cst = arith.constant dense<0.000000e+00> : vector<8x128xf32>
    %4 = tpu.matmul %0, %1, %cst {dimension_numbers = #tpu.dot_dimension_numbers<[1], [0], [0], [1], [0, 0, 1, 1], [], []>} : vector<8x4xf32>, vector<4x128xf32>, vector<8x128xf32> -> vector<8x128xf32>
    %5 = vector.broadcast %2 : vector<1x128xf32> to vector<8x128xf32>
    %6 = arith.addf %4, %5 : vector<8x128xf32>
    %cst_5 = arith.constant 0.000000e+00 : f32
    %7 = vector.broadcast %cst_5 : f32 to vector<8x128xf32>
    %8 = arith.maximumf %6, %7 : vector<8x128xf32>
    %cst_6 = arith.constant dense<0.000000e+00> : vector<8x128xf32>
    %9 = tpu.matmul %8, %3, %cst_6 {dimension_numbers = #tpu.dot_dimension_numbers<[1], [0], [0], [1], [0, 0, 1, 1], [], []>} : vector<8x128xf32>, vector<128x128xf32>, vector<8x128xf32> -> vector<8x128xf32>
    %c0_7 = arith.constant 0 : index
    %c0_8 = arith.constant 0 : index
    %10 = vector.load %arg2[%c0_7, %c0_8] : memref<8x128xf32, #tpu.memory_space<vmem>>, vector<8x128xf32>
    tpu.vector_store %arg2[%c0_7, %c0_8], %9 {strides = array<i32>} : memref<8x128xf32, #tpu.memory_space<vmem>>, vector<8x128xf32>,
    return
  }
}

</mosaic_0001>

<bundles_post_ra>
// kernel: net_forward_slab.1
= control target key start
LH: loop header
LB: loop body
LE: loop exit
PB: predicated region body
PF: predicated region fallthrough
CT: control target
= control target key end

     0   :  { %7 = vsyncpa [#allocation3], 0  ;;  %s202_s0 = inlined_call_operand.vmem [shape: f32[8,4], index: 0, kind: input, shape index: {}]   ;;  %s203_s1 = inlined_call_operand.hbm [shape: f32[136,128], index: 1, kind: input, shape index: {}]   ;;  %s204_s2 = inlined_call_operand.hbm [shape: f32[8,128], index: 2, kind: output, shape index: {}]  }
   0x1   :  { %8 = vsyncpa [#allocation4], 0  ;;  %s15_s11 = sshll.u32 %s203_s1, 4  ;;  %s174_s12 = smov [#allocation2]   ;;  %s16_s11 = int_to_ptr.hbm [resolvable:$true] %s15_s11 }
   0x2   :  { %s17_s13 = sshll.u32 %s174_s12, 4  ;;  %s175_s14 = smov 128   ;;  %s18_s13 = int_to_ptr.vmem [resolvable:$true] %s17_s13 }
   0x3   :  { %s176_s15 = smov 8  }
   0x4   :  { %23 = dma.hbm_to_vmem [thread:$0]  %s16_s11, 2176, %s18_s13, [#allocation3], %s175_s14, %s175_s14, %s176_s15  }
   0x5   :  { %170 = dma.done.wait [#allocation3], 2176  }
   0x6   :  { %171 = vsyncadd [#allocation3], 4294965120  ;;  %vm52_vm0 = vcmask 1043456   ;;  %vm48_vm1 = vcmask 31744   ;;  %v29_v0 = vld [vmem:[#allocation2] sm:$0xf] }
   0x7   :  { %v28_v1 = vld [vmem:[%s202_s0] sm:$0xff]  ;;  %115 = vmatpush.msk.msra.mxu0 %vm52_vm0, %v29_v0  ;;  %v45_v3 = vld [vmem:[#allocation2 + $0x78] sm:$0xff]  ;;  %v44_v4 = vld [vmem:[#allocation2 + $0x70] sm:$0xff]  ;;  %s177_s0 = smov [#allocation5]   ;;  %s105_s20 = sshll.u32 %s204_s2, 4  ;;  %s106_s20 = int_to_ptr.hbm [resolvable:$true] %s105_s20 }
   0x8   :  { %v46_v2 = vld [vmem:[#allocation2 + $0x80] sm:$0xff]  ;;  %116 = vmatmul.msk.f32.vlgmr.msra.gmra.mxu0 %vm48_vm1, %v28_v1  ;;  %v43_v5 = vld [vmem:[#allocation2 + $0x68] sm:$0xff]  ;;  %v41_v7 = vld [vmem:[#allocation2 + $0x58] sm:$0xff]  ;;  %s103_s1 = sshll.u32 %s177_s0, 4  ;;  %s104_s1 = int_to_ptr.vmem [resolvable:$true] %s103_s1 }
   0x9   :  { %77 = vmatpush.msra.mxu1 %v46_v2  ;;  %v42_v6 = vld [vmem:[#allocation2 + $0x60] sm:$0xff]  ;;  %v40_v8 = vld [vmem:[#allocation2 + $0x50] sm:$0xff]  ;;  %v39_v9 = vld [vmem:[#allocation2 + $0x48] sm:$0xff] }
   0xa   :  { %v38_v10 = vld [vmem:[#allocation2 + $0x40] sm:$0xff]  ;;  %v37_v11 = vld [vmem:[#allocation2 + $0x38] sm:$0xff]  ;;  %v36_v12 = vld [vmem:[#allocation2 + $0x30] sm:$0xff] }
   0xb   :  { %78 = vmatpush.msra.mxu1 %v45_v3  ;;  %v35_v13 = vld [vmem:[#allocation2 + $0x28] sm:$0xff]  ;;  %v34_v14 = vld [vmem:[#allocation2 + $0x20] sm:$0xff]  ;;  %v33_v15 = vld [vmem:[#allocation2 + $0x18] sm:$0xff] }
   0xc   :  { %v32_v16 = vld [vmem:[#allocation2 + $0x10] sm:$0xff]  ;;  %v31_v17 = vld [vmem:[#allocation2 + $0x8] sm:$0xff]  ;;  %v121_v18 = vld [vmem:[#allocation2 + $0x4] ss:$0 sm:$0xff] }
   0xd   :  { %79 = vmatpush.msra.mxu1 %v44_v4 }
   0xf   :  { %80 = vmatpush.msra.mxu1 %v43_v5 }
  0x11   :  { %81 = vmatpush.msra.mxu1 %v42_v6 }
  0x13   :  { %82 = vmatpush.msra.mxu1 %v41_v7 }
  0x15   :  { %83 = vmatpush.msra.mxu1 %v40_v8 }
  0x17   :  { %84 = vmatpush.msra.mxu1 %v39_v9 }
  0x19   :  { %85 = vmatpush.msra.mxu1 %v38_v10 }
  0x1b   :  { %86 = vmatpush.msra.mxu1 %v37_v11 }
  0x1d   :  { %87 = vmatpush.msra.mxu1 %v36_v12 }
  0x1f   :  { %88 = vmatpush.msra.mxu1 %v35_v13 }
  0x21   :  { %89 = vmatpush.msra.mxu1 %v34_v14 }
  0x23   :  { %90 = vmatpush.msra.mxu1 %v33_v15 }
  0x25   :  { %91 = vmatpush.msra.mxu1 %v32_v16 }
  0x27   :  { %92 = vmatpush.msra.mxu1 %v31_v17 }
  0x85   :  { %v73_v19 = vpop.f32.mrf.mxu0 }
  0x86   :  { %v74_v20 = vadd.f32 %v121_v18, %v73_v19 }
  0x88   :  { %v76_v21 = vmax.f32 %v74_v20, 0.0 }
  0x8a   :  { %93 = vmatmul.f32.vlgmr.msra.gmra.mxu1 %v76_v21 }
 0x107   :  { %v94_v22 = vpop.f32.mrf.mxu1 }
 0x108   :  { %97 = vst [vmem:[#allocation5] sm:$0xff] %v94_v22 }
 0x109   :  { %108 = dma.vmem_to_hbm [thread:$0]  %s104_s1, 128, %s106_s20, [#allocation4]  }
 0x10a   :  { %172 = dma.done.wait [#allocation4], 128  }
 0x10b   :  { %173 = vsyncadd [#allocation4], 4294967168 }
 0x10c   :  { %113 = vsyncpa [#allocation3], 1 }
 0x10d   :  { %114 = vsyncpa [#allocation4], 1 }

</bundles_post_ra>
